<compile_context>
chip_gen: v6e
topology: v6e:2x2x1
jax: 0.10.0
libtpu: 0.0.40
codegen_flags: <defaults>
</compile_context>

<pallas_src>
import math

import jax
import jax.numpy as jnp
from jax import lax
from jax.experimental import pallas as pl
from jax.experimental.pallas import tpu as pltpu


def _make_exp_loss_kernel(row_tile, chunk_rows, lanes, rows_valid_last, has_tail):
    """Kernel writing one (8, lanes) partial sum of exp(|o - t|) per grid step."""
    n_chunks = row_tile // chunk_rows

    def compute(o_ref, t_ref, masked):
        def body(c, acc):
            start = pl.multiple_of(c * chunk_rows, chunk_rows)
            ob = o_ref[pl.ds(start, chunk_rows), :].astype(jnp.float32)
            tb = t_ref[pl.ds(start, chunk_rows), :].astype(jnp.float32)
            e = jnp.exp(jnp.abs(ob - tb))  # EUP exp; VALU sub/abs co-issue
            if masked:
                # Only emitted for the tail block: drop rows past the array end.
                row = lax.broadcasted_iota(jnp.int32, (chunk_rows, lanes), 0) + start
                e = jnp.where(row < rows_valid_last, e, jnp.float32(0.0))
            # Fold sublane groups of 8 into the vreg-shaped accumulator
            # (tile-preserving reshape + VALU adds, no XLU).
            return acc + jnp.sum(e.reshape(chunk_rows // 8, 8, lanes), axis=0)

        acc0 = jnp.zeros((8, lanes), jnp.float32)
        return lax.fori_loop(0, n_chunks, body, acc0, unroll=True)

    def kernel(o_ref, t_ref, part_ref):
        if has_tail:
            j = pl.program_id(0)
            last = pl.num_programs(0) - 1

            @pl.when(j == last)
            def _():
                part_ref[...] = compute(o_ref, t_ref, True)[None, :, :]

            @pl.when(j != last)
            def _():
                part_ref[...] = compute(o_ref, t_ref, False)[None, :, :]
        else:
            part_ref[...] = compute(o_ref, t_ref, False)[None, :, :]

    return kernel


def exp_loss(output, target, *, block_rows=8192, lanes=128, chunk_rows=512):
    assert output.shape == target.shape
    b = output.shape[0]
    n = math.prod(output.shape)

    o = output.reshape(-1)
    t = target.reshape(-1)

    itemsize = jnp.dtype(output.dtype).itemsize
    sub = {4: 8, 2: 16, 1: 32}.get(itemsize, 8)  # sublane multiple per dtype

    # Pad only to (sub*lanes) alignment (cheap); padded zeros each contribute
    # exp(0)=1 and are subtracted from the total in the wrapper (no in-kernel mask).
    min_tile = sub * lanes
    pad = (-n) % min_tile
    if pad:
        o = jnp.pad(o, (0, pad))
        t = jnp.pad(t, (0, pad))
    n_rows = (n + pad) // lanes  # multiple of sub

    # Row-block size: as big as the VMEM budget allows (DMA economics dominate),
    # but keep grid >= 2 for medium inputs so v7x can use both TensorCores.
    rt = min(block_rows, n_rows)
    if n_rows >= 2 * sub:
        half = max(sub, (pl.cdiv(n_rows, 2) // sub) * sub)
        rt = min(rt, half)
    rt = max(sub, (rt // sub) * sub)
    # Make rt a multiple of the inner accumulation chunk.
    ck = max(sub, (min(chunk_rows, rt) // sub) * sub)
    rt = max(ck, (rt // ck) * ck)

    grid = pl.cdiv(n_rows, rt)
    has_tail = (grid * rt) != n_rows
    rows_valid_last = n_rows - (grid - 1) * rt  # block-local valid rows, last step

    o2 = o.reshape(n_rows, lanes)
    t2 = t.reshape(n_rows, lanes)

    kernel = _make_exp_loss_kernel(rt, ck, lanes, rows_valid_last, has_tail)

    # VMEM budget: 2 inputs x 2 pipeline buffers x (rt, lanes) + headroom.
    # Capped at 48 MiB so the request is always below v7x's 64 MiB/TC.
    in_block_bytes = rt * lanes * itemsize
    vmem_limit = int(min(max(4 * in_block_bytes + (8 << 20), 32 << 20), 48 << 20))

    cost = pl.CostEstimate(
        flops=4 * n,
        transcendentals=n,
        bytes_accessed=2 * (n + pad) * itemsize + grid * 8 * lanes * 4,
    )

    partials = pl.pallas_call(
        kernel,
        out_shape=jax.ShapeDtypeStruct((grid, 8, lanes), jnp.float32),
        grid_spec=pltpu.PrefetchScalarGridSpec(
            num_scalar_prefetch=0,
            grid=(grid,),
            in_specs=[
                pl.BlockSpec((rt, lanes), lambda j: (j, 0)),
                pl.BlockSpec((rt, lanes), lambda j: (j, 0)),
            ],
            out_specs=pl.BlockSpec((1, 8, lanes), lambda j: (j, 0, 0)),
        ),
        compiler_params=pltpu.CompilerParams(
            dimension_semantics=("parallel",),
            vmem_limit_bytes=vmem_limit,
        ),
        cost_estimate=cost,
    )(o2, t2)

    # Final cross-lane reduce, pad correction (exp(0)=1 per padded element),
    # and normalization by batch size.
    total = jnp.sum(partials) - jnp.float32(pad)
    return total / b


def exp_loss_ref(output, target):
    return jnp.sum(jnp.exp(jnp.abs(output - target))) / output.shape[0]


if __name__ == "__main__":
    key = jax.random.PRNGKey(0)
    k1, k2 = jax.random.split(key)
    x_shape = (2, 4, 16, 16)  # NCHW, like PyTorch
    output = jax.random.normal(k1, x_shape, dtype=jnp.float32)
    target = jax.random.normal(k2, x_shape, dtype=jnp.float32)

    loss = exp_loss(output, target)
    jax.block_until_ready(loss)

    ref = exp_loss_ref(output, target)
    assert jnp.allclose(loss, ref, rtol=1e-5, atol=1e-5), (loss, ref)
    print("KERNEL_OK")
</pallas_src>

<mosaic_0001>
module attributes {stable_mosaic.version = 11 : i64} {
  func.func @kernel(%arg0: i32, %arg1: memref<8x128xf32, #tpu.memory_space<vmem>>, %arg2: memref<8x128xf32, #tpu.memory_space<vmem>>, %arg3: memref<1x8x128xf32, #tpu.memory_space<vmem>>) attributes {dimension_semantics = [#tpu.dimension_semantics<parallel>], iteration_bounds = array<i64: 2>, scalar_prefetch = 0 : i64, scratch_operands = 0 : i64, tpu.core_type = #tpu.core_type<tc>, window_params = [{transform_indices = @transform_0, window_bounds = array<i64: 8, 128>}, {transform_indices = @transform_1, window_bounds = array<i64: 8, 128>}, {transform_indices = @transform_2, window_bounds = array<i64: 1, 8, 128>}]} {
    %cst = arith.constant 0.000000e+00 : f32
    %0 = vector.broadcast %cst : f32 to vector<8x128xf32>
    %c0_i32 = arith.constant 0 : i32
    %c8_i32 = arith.constant 8 : i32
    %1 = arith.muli %c0_i32, %c8_i32 : i32
    %2 = tpu.assume_multiple %1, 8 : i32
    %3 = arith.index_cast %2 : i32 to index
    %c0 = arith.constant 0 : index
    %4 = vector.load %arg1[%3, %c0] : memref<8x128xf32, #tpu.memory_space<vmem>>, vector<8x128xf32>
    %5 = arith.index_cast %2 : i32 to index
    %c0_0 = arith.constant 0 : index
    %6 = vector.load %arg2[%5, %c0_0] : memref<8x128xf32, #tpu.memory_space<vmem>>, vector<8x128xf32>
    %7 = arith.subf %4, %6 : vector<8x128xf32>
    %8 = math.absf %7 : vector<8x128xf32>
    %9 = math.exp %8 : vector<8x128xf32>
    %10 = vector.shape_cast %9 : vector<8x128xf32> to vector<1x8x128xf32>
    %cst_1 = arith.constant dense<0.000000e+00> : vector<8x128xf32>
    %11 = vector.multi_reduction <add>, %10, %cst_1 [0] : vector<1x8x128xf32> to vector<8x128xf32>
    %12 = arith.addf %0, %11 : vector<8x128xf32>
    %c1_i32 = arith.constant 1 : i32
    %13 = vector.shape_cast %12 : vector<8x128xf32> to vector<1x8x128xf32>
    %c0_2 = arith.constant 0 : index
    %c0_3 = arith.constant 0 : index
    %c0_4 = arith.constant 0 : index
    %14 = vector.load %arg3[%c0_2, %c0_3, %c0_4] : memref<1x8x128xf32, #tpu.memory_space<vmem>>, vector<1x8x128xf32>
    tpu.vector_store %arg3[%c0_2, %c0_3, %c0_4], %13 {strides = array<i32>} : memref<1x8x128xf32, #tpu.memory_space<vmem>>, vector<1x8x128xf32>,
    return
  }
  func.func @transform_0(%arg0: i32) -> (i32, i32) {
    %c0_i32 = arith.constant 0 : i32
    %c0_i32_0 = arith.constant 0 : i32
    return %arg0, %c0_i32 : i32, i32
  }
  func.func @transform_1(%arg0: i32) -> (i32, i32) {
    %c0_i32 = arith.constant 0 : i32
    %c0_i32_0 = arith.constant 0 : i32
    return %arg0, %c0_i32 : i32, i32
  }
  func.func @transform_2(%arg0: i32) -> (i32, i32, i32) {
    %c0_i32 = arith.constant 0 : i32
    %c0_i32_0 = arith.constant 0 : i32
    %c0_i32_1 = arith.constant 0 : i32
    return %arg0, %c0_i32, %c0_i32_0 : i32, i32, i32
  }
}

</mosaic_0001>

<bundles_post_ra>
// kernel: tpu_custom_call.1
= control target key start
LH: loop header
LB: loop body
LE: loop exit
PB: predicated region body
PF: predicated region fallthrough
CT: control target
= control target key end

     0   :  { %7 = vsyncpa [#allocation3], 0  ;;  %s724_s0 = inlined_call_operand.hbm [shape: f32[16,128], index: 0, kind: input, shape index: {}]   ;;  %s725_s1 = inlined_call_operand.hbm [shape: f32[16,128], index: 1, kind: input, shape index: {}]   ;;  %s726_s2 = inlined_call_operand.hbm [shape: f32[2,8,128], index: 2, kind: output, shape index: {}]  }
   0x1   :  { %9 = vsyncpa [#allocation3 + $0x1], 0 }
   0x2   :  { %10 = vsyncpa [#allocation6], 0 }
   0x3   :  { %12 = vsyncpa [#allocation6 + $0x1], 0 }
   0x4   :  { %13 = vsyncpa [#allocation4], 0 }
   0x5   :  { %15 = vsyncpa [#allocation4 + $0x1], 0  ;;  %s524_s9 = smov 0   ;;  %s526_s10 = smov 0  }
   0x6   :  { %s528_s11 = smov 0   ;;  %s530_s12 = smov 0  }
   0x7 LB: > { %s545_s13 = sadd.s32 4294967295, %s504_s12   ;;  %s312_s14 = sadd.s32 4294967294, %s504_s12   ;;  %s504_s12 = sphi %s530_s12, %s745_s12   ;;  %s500_s11 = sphi %s528_s11, %s744_s11   ;;  %s496_s10 = sphi %s526_s10, %s743_s10   ;;  %s492_s9 = sphi %s524_s9, %s742_s9  }
   0x8   : > { %s549_s15 = sadd.s32 1, %s504_s12   ;;  %s28_s16 = sadd.s32 1, %s500_s11 }
   0x9   : > { %s25_s17 = ssub.s32 %s504_s12, %s549_s15  ;;  %p35_p0 = scmp.ne.s32.totalorder %s500_s11, %s496_s10 }
   0xa   : > { %p26_p1 = scmp.eq.s32.totalorder %s25_s17, 0  ;;  %p36_p2 = scmp.eq.s32.totalorder %s504_s12, 0 }
   0xb   : > { %p41_p3 = scmp.ne.s32.totalorder %s496_s10, %s492_s9  ;;  %p42_p4 = scmp.eq.s32.totalorder %s545_s13, 0 }
   0xc   : > { %s561_s18 = scalar_select %p26_p1, %s500_s11, %s28_s16  }
   0xd   : > { %p563_p5 = por %p36_p2, %p35_p0  ;;  %p567_p6 = por %p42_p4, %p41_p3 }
   0xe   : > { %p91_p7 = scmp.eq.s32.totalorder %s545_s13, 1  ;;  %p97_p8 = scmp.eq.s32.totalorder %s312_s14, 1 }
   0xf   : > { %s730_s20 = scalar_select %p567_p6, 1, 0 }
  0x10   : > { %p344_p10 = scmp.lt.s32.totalorder %s504_s12, 2  ;;  %p574_p11 = por %p91_p7, %p35_p0 }
  0x11   : > { %p578_p12 = por %p97_p8, %p41_p3  ;;  %s583_s23 = sand.u32 1, %s500_s11  }
  0x12   : > { %s731_s21 = scalar_select %p574_p11, 1, 0 }
  0x13   : > { %s732_s22 = scalar_select %p578_p12, 1, 0 }
  0x14   : > { %s316_s24 = sshll.u32 %s504_s12, 7  ;;  %s315_s25 = sshll.u32 %s583_s23, 3 }
  0x15   : > { %s592_s28 = scalar_lea.hbm %s724_s0, %s316_s24  ;;  %s121_s29 = scalar_lea.vmem [#allocation2], %s315_s25 }
  0x16   : > { %s128_s30 = sshll.u32 %s121_s29, 4  ;;  %p598_p13 = pnand %p344_p10, %p563_p5  ;;  %s602_s30 = int_to_ptr.vmem [resolvable:$true] %s128_s30 }
  0x17   : > { %s118_s4 = scalar_lea.sflag [#allocation3], %s583_s23  ;;  %s380_s5 = scalar_lea.hbm %s592_s28, 128 }
  0x18   : > { %p381_p2 = scmp.ne.s32.totalorder %s592_s28, %s380_s5  ;;  %p382_p3 = pneg %p598_p13 }
  0x19   : > { %s385_s8 = scalar_lea.hbm %s724_s0, 256  ;;  %p386_p5 = scmp.lt.s32.totalorder %s592_s28, %s724_s0 }
  0x1a   : > { %p383_p4 = pnand %p382_p3, %p381_p2  ;;  %p387_p8 = scmp.lt.s32.totalorder %s385_s8, %s380_s5 }
  0x1c   : > { %p384_p7 = pneg %p383_p4  ;;  %p388_p10 = por %p387_p8, %p386_p5 }
  0x1e   : > { %p389_p9 = pnand %p388_p10, %p384_p7 }
  0x20   : > { %392 = shalt.err (!%p389_p9)
}
  0x21   : > { %s393_s17 = scalar_lea.vmem %s602_s30, 128  ;;  %s506_s19 = smov [#allocation2]  }
  0x22   : > { %p394_p0 = scmp.ne.s32.totalorder %s602_s30, %s393_s17  ;;  %s398_s26 = sshll.u32 %s506_s19, 4  ;;  %s399_s26 = int_to_ptr.vmem [resolvable:$false] %s398_s26 }
  0x23   : > { %s400_s27 = scalar_lea.vmem %s399_s26, 256  ;;  %p401_p1 = scmp.lt.s32.totalorder %s602_s30, %s399_s26 }
  0x24   : > { %p396_p2 = pnand %p394_p0, %p382_p3  ;;  %p402_p12 = scmp.lt.s32.totalorder %s400_s27, %s393_s17 }
  0x26   : > { %p397_p4 = pneg %p396_p2  ;;  %p403_p11 = por %p402_p12, %p401_p1 }
  0x28   : > { %p404_p5 = pnand %p403_p11, %p397_p4 }
  0x2a   : > { %407 = shalt.err (!%p404_p5)
}
  0x2b   : > { %336 = dma.hbm_to_vmem [thread:$0]  (!%p598_p13), %s592_s28, 128, %s602_s30, %s118_s4  }
  0x2c   : > { %p734_p9 = scmp.lt.s32.totalorder %s504_s12, 3  ;;  %p735_p0 = scmp.ge.s32.totalorder %s504_s12, 1 }
  0x2d   : > { %s644_s7 = scalar_lea.hbm %s725_s1, %s316_s24  ;;  %s139_s8 = scalar_lea.vmem [#allocation5], %s315_s25 }
  0x2e   : > { %p635_p7 = pnand %p735_p0, %p734_p9  ;;  %s146_s14 = sshll.u32 %s139_s8, 4  ;;  %s147_s14 = int_to_ptr.vmem [resolvable:$true] %s146_s14 }
  0x2f   : > { %s136_s28 = scalar_lea.sflag [#allocation6], %s583_s23  ;;  %s408_s30 = scalar_lea.hbm %s644_s7, 128 }
  0x30   : > { %s736_s29 = scalar_select %p635_p7, 1, 0 }
  0x31   : > { %p409_p11 = scmp.ne.s32.totalorder %s644_s7, %s408_s30  ;;  %s413_s17 = scalar_lea.hbm %s725_s1, 256 }
  0x32   : > { %p414_p8 = scmp.lt.s32.totalorder %s644_s7, %s725_s1  ;;  %p415_p10 = scmp.lt.s32.totalorder %s413_s17, %s408_s30 }
  0x33   : > { %p411_p12 = pnand %p409_p11, %p382_p3 }
  0x34   : > { %p416_p2 = por %p415_p10, %p414_p8 }
  0x35   : > { %p412_p1 = pneg %p411_p12 }
  0x37   : > { %p417_p4 = pnand %p416_p2, %p412_p1 }
  0x39   : > { %420 = shalt.err (!%p417_p4)
}
  0x3a   : > { %s421_s25 = scalar_lea.vmem %s147_s14, 128  ;;  %s507_s23 = smov [#allocation5]  }
  0x3b   : > { %p422_p5 = scmp.ne.s32.totalorder %s147_s14, %s421_s25  ;;  %s426_s26 = sshll.u32 %s507_s23, 4  ;;  %s427_s26 = int_to_ptr.vmem [resolvable:$false] %s426_s26 }
  0x3c   : > { %s428_s27 = scalar_lea.vmem %s427_s26, 256  ;;  %p429_p11 = scmp.lt.s32.totalorder %s147_s14, %s427_s26 }
  0x3d   : > { %p424_p9 = pnand %p422_p5, %p382_p3  ;;  %p430_p12 = scmp.lt.s32.totalorder %s428_s27, %s421_s25 }
  0x3f   : > { %p425_p0 = pneg %p424_p9  ;;  %p431_p6 = por %p430_p12, %p429_p11 }
  0x41   : > { %p432_p7 = pnand %p431_p6, %p425_p0 }
  0x43   : > { %435 = shalt.err (!%p432_p7)
}
  0x44   : > { %339 = dma.hbm_to_vmem [thread:$0]  (!%p598_p13), %s644_s7, 128, %s147_s14, %s136_s28  }
  0x45   : > { %p737_p1 = scmp.ne.s32.totalorder %s736_s29, 0 }
  0x46   : > { %s670_s5 = sand.u32 (!%p737_p1), 1, %s496_s10   ;;  %p738_p3 = scmp.ne.s32.totalorder (!%p737_p1), %s730_s20, 0 }
  0x47   : > { %155 = sbr.rel (%p737_p1) target bundleno = 113 (0x71), region = 28  ;;  %s320_s6 = sshll.u32 (!%p737_p1), %s670_s5, 3 }
  0x48   : > { %s158_s8 = scalar_lea.sflag (!%p737_p1), [#allocation3], %s670_s5  ;;  %s161_s30 = scalar_lea.vmem (!%p737_p1), [#allocation2], %s320_s6 }
  0x4c   : > { %479 = dma.done.wait (%p738_p3), %s158_s8, 128  }
  0x4d   : > { %481 = vsyncadd (%p738_p3), %s158_s8, 4294967168  ;;  %s167_s3 = scalar_lea.sflag [#allocation6], %s670_s5  ;;  %s170_s7 = scalar_lea.vmem [#allocation5], %s320_s6 }
  0x4e   : > { %483 = dma.done.wait (%p738_p3), %s167_s3, 128  }
  0x4f   : > { %485 = vsyncadd (%p738_p3), %s167_s3, 4294967168  ;;  %v196_v0 = vld [vmem:[%s161_s30] sm:$0xff]  ;;  %v197_v1 = vld [vmem:[%s170_s7] sm:$0xff]  ;;  %s195_s29 = scalar_lea.vmem [#allocation7], %s320_s6  ;;  %s324_s28 = sshll.u32 %s545_s13, 7 }
  0x50   : > { %v198_v2 = vsub.f32 %v196_v0, %v197_v1  ;;  %s219_s14 = sshll.u32 %s195_s29, 4  ;;  %s217_s20 = scalar_lea.hbm %s726_s2, %s324_s28  ;;  %s684_s14 = int_to_ptr.vmem [resolvable:$true] %s219_s14 }
  0x51   : > { %s206_s17 = scalar_lea.sflag [#allocation4], %s670_s5  ;;  %s436_s24 = scalar_lea.vmem %s684_s14, 128 }
  0x52   : > { %v199_v3 = vand.u32 2147483647, %v198_v2  ;;  %p437_p6 = scmp.ne.s32.totalorder %s684_s14, %s436_s24  ;;  %p739_p13 = scmp.ne.s32.totalorder %s731_s21, 0 }
  0x53   : > { %s508_s19 = smov [#allocation7]  }
  0x54   : > { %v200_v4 = vmul.f32 1.442695, %v199_v3  ;;  %p438_p7 = pnand %p437_p6, %p739_p13  ;;  %s440_s25 = sshll.u32 %s508_s19, 4  ;;  %s441_s25 = int_to_ptr.vmem [resolvable:$false] %s440_s25 }
  0x55   : > { %s442_s13 = scalar_lea.vmem %s441_s25, 256  ;;  %p443_p10 = scmp.lt.s32.totalorder %s684_s14, %s441_s25 }
  0x56   : > { %378 = vpow2.f32 %v200_v4  ;;  %p439_p8 = pneg %p438_p7  ;;  %p444_p2 = scmp.lt.s32.totalorder %s442_s13, %s436_s24 }
  0x58   : > { %p445_p4 = por %p444_p2, %p443_p10 }
  0x5a   : > { %p446_p5 = pnand %p445_p4, %p439_p8 }
  0x63   : > { %v379_v5 = vpop.eup %378 }
  0x64   : > { %204 = vst [vmem:[%s195_s29] sm:$0xff] %v379_v5 }
  0x65   : > { %449 = shalt.err (!%p446_p5)
}
  0x66   : > { %s450_s23 = scalar_lea.hbm %s217_s20, 128  ;;  %s454_s5 = scalar_lea.hbm %s726_s2, 256 }
  0x67   : > { %p451_p9 = scmp.ne.s32.totalorder %s217_s20, %s450_s23  ;;  %p455_p12 = scmp.lt.s32.totalorder %s217_s20, %s726_s2 }
  0x68   : > { %p456_p1 = scmp.lt.s32.totalorder %s454_s5, %s450_s23 }
  0x69   : > { %p452_p0 = pnand %p451_p9, %p739_p13 }
  0x6a   : > { %p457_p3 = por %p456_p1, %p455_p12 }
  0x6b   : > { %p453_p11 = pneg %p452_p0 }
  0x6d   : > { %p458_p6 = pnand %p457_p3, %p453_p11 }
  0x6f   : > { %461 = shalt.err (!%p458_p6)
}
  0x70   : > { %331 = dma.vmem_to_hbm [thread:$0]  (%p739_p13), %s684_s14, 128, %s217_s20, %s206_s17  }
  0x71 PF: > { %s231_s30 = sand.u32 1, %s492_s9   ;;  %p740_p7 = scmp.ne.s32.totalorder %s732_s22, 0 }
  0x72   : > { %p741_p8 = scmp.ge.s32.totalorder %s504_s12, 2  ;;  %s232_s3 = scalar_lea.sflag [#allocation4], %s231_s30 }
  0x74   : > { %p341_p10 = pnand %p741_p8, %p740_p7 }
  0x76   : > { %p342_p2 = pneg %p341_p10 }
  0x78   : > { %487 = dma.done.wait (%p342_p2), %s232_s3, 128  }
  0x79   : > { %489 = vsyncadd (%p342_p2), %s232_s3, 4294967168  ;;  %p18_p4 = scmp.ge.s32.totalorder %s549_s15, 4   ;;  %s742_s9 = smov %s496_s10 }
  0x7a   : > { %s743_s10 = smov %s500_s11  ;;  %s744_s11 = smov %s561_s18 }
  0x7b   : > { %s745_s12 = smov %s549_s15  ;;  %20 = sbr.rel (!%p18_p4) target bundleno = 7 (0x7), region = 86 }
  0x80   :  { %237 = vsyncpa [#allocation3], 1 }
  0x81   :  { %239 = vsyncpa [#allocation3 + $0x1], 1 }
  0x82   :  { %240 = vsyncpa [#allocation6], 1 }
  0x83   :  { %242 = vsyncpa [#allocation6 + $0x1], 1 }
  0x84   :  { %243 = vsyncpa [#allocation4], 1 }
  0x85   :  { %245 = vsyncpa [#allocation4 + $0x1], 1 }

</bundles_post_ra>
